<compile_context>
chip_gen: v7x
topology: tpu7x:2x2x1
jax: 0.10.0
libtpu: 0.0.40
codegen_flags: <defaults>
</compile_context>

<pallas_src>
import functools

import jax
import jax.numpy as jnp
from jax.experimental import pallas as pl
from jax.experimental.pallas import tpu as pltpu


def _convnet_kernel(x_ref, w1_ref, b1_ref, w2_ref, b2_ref, o_ref, *, B, L):
    """Whole ConvNet forward for a small batch.

    x_ref : (B, 1, L)   input, length on lanes
    w1_ref: (2, C1, 1)  conv1 taps, per-output-channel columns  w1_ref[k, co, 0] = W1[co, 0, k]
    b1_ref: (C1, 1)     conv1 bias
    w2_ref: (2, C1, 1)  conv2 taps, per-input-channel columns   w2_ref[k, ci, 0] = W2[0, ci, k]
    b2_ref: (1, 1)      conv2 bias
    o_ref : (B, 1, L)   output (ReLU(conv2(ReLU(conv1(x)))))
    """
    # Hoist all parameter loads out of the (unrolled) batch loop.
    w1t0 = w1_ref[0]            # (C1, 1)
    w1t1 = w1_ref[1]            # (C1, 1)
    b1 = b1_ref[...]            # (C1, 1)
    w2t0 = w2_ref[0]            # (C1, 1)
    w2t1 = w2_ref[1]            # (C1, 1)
    b2 = b2_ref[...]            # (1, 1)

    zero = jnp.zeros((1, 1), jnp.float32)
    for bi in range(B):
        xb = x_ref[bi]                                           # (1, L)
        # In-kernel zero padding: x_pad[t], x_pad[t+1], x_pad[t+2] for t = 0..L-1.
        x_lo = jnp.concatenate([zero, xb[:, : L - 1]], axis=1)   # [0, x0, ..., x_{L-2}]
        x_hi = jnp.concatenate([xb[:, 1:], zero], axis=1)        # [x1, ..., x_{L-1}, 0]

        # Layer 1: Conv1d(1, C1, k=2, pad=1) + ReLU, evaluated only at the two
        # positions (t and t+1) that layer 2 consumes — VPU broadcast MACs.
        y1_a = jnp.maximum(w1t0 * x_lo + w1t1 * xb + b1, 0.0)    # y1[:, t]    (C1, L)
        y1_b = jnp.maximum(w1t0 * xb + w1t1 * x_hi + b1, 0.0)    # y1[:, t+1]  (C1, L)

        # Layer 2: Conv1d(C1, 1, k=2) + ReLU: per-channel scale then sublane reduce.
        z = w2t0 * y1_a + w2t1 * y1_b                            # (C1, L)
        y2 = jnp.sum(z, axis=0, keepdims=True) + b2              # (1, L)
        o_ref[bi] = jnp.maximum(y2, 0.0)                         # lane-dense store


def convnet_forward(x, w1, b1, w2, b2):
    """x: (B, 1, L) float -> (B, 1, L). Entire network in a single pallas_call."""
    B, _, L = x.shape
    C1 = w1.shape[0]

    # Boundary-only repacking: taps leading, channels on sublanes, width-1 lane column.
    w1p = jnp.transpose(w1[:, 0, :], (1, 0))[:, :, None].astype(jnp.float32)   # (2, C1, 1)
    b1c = b1.reshape(C1, 1).astype(jnp.float32)
    w2p = jnp.transpose(w2[0, :, :], (1, 0))[:, :, None].astype(jnp.float32)   # (2, C1, 1)
    b2c = b2.reshape(1, 1).astype(jnp.float32)

    kernel = functools.partial(_convnet_kernel, B=B, L=L)
    return pl.pallas_call(
        kernel,
        out_shape=jax.ShapeDtypeStruct((B, 1, L), jnp.float32),
        grid=(1,),
        in_specs=[
            pl.BlockSpec((B, 1, L), lambda i: (0, 0, 0)),
            pl.BlockSpec((2, C1, 1), lambda i: (0, 0, 0)),
            pl.BlockSpec((C1, 1), lambda i: (0, 0)),
            pl.BlockSpec((2, C1, 1), lambda i: (0, 0, 0)),
            pl.BlockSpec((1, 1), lambda i: (0, 0)),
        ],
        out_specs=pl.BlockSpec((B, 1, L), lambda i: (0, 0, 0)),
        compiler_params=pltpu.CompilerParams(
            dimension_semantics=("arbitrary",)),
    )(x.astype(jnp.float32), w1p, b1c, w2p, b2c)


def ref_forward(x, w1, b1, w2, b2):
    """Pure-JAX reference mirroring the PyTorch forward."""
    y = jax.lax.conv_general_dilated(
        x.astype(jnp.float32), w1.astype(jnp.float32),
        window_strides=(1,), padding=((1, 1),),
        dimension_numbers=("NCH", "OIH", "NCH"),
        precision=jax.lax.Precision.HIGHEST)
    y = jnp.maximum(y + b1[None, :, None], 0.0)
    y = jax.lax.conv_general_dilated(
        y, w2.astype(jnp.float32),
        window_strides=(1,), padding=((0, 0),),
        dimension_numbers=("NCH", "OIH", "NCH"),
        precision=jax.lax.Precision.HIGHEST)
    y = jnp.maximum(y + b2[None, :, None], 0.0)
    return y


if __name__ == "__main__":
    key = jax.random.PRNGKey(0)
    kx, k1w, k1b, k2w, k2b = jax.random.split(key, 5)

    B, L, C1 = 2, 128, 60
    x = jax.random.normal(kx, (B, 1, L), jnp.float32)

    # Deterministic PyTorch-style (fan-in) parameter init matching nn.Conv1d shapes.
    bound1 = 1.0 / (1 * 2) ** 0.5
    w1 = jax.random.uniform(k1w, (C1, 1, 2), jnp.float32, -bound1, bound1)
    b1 = jax.random.uniform(k1b, (C1,), jnp.float32, -bound1, bound1)
    bound2 = 1.0 / (C1 * 2) ** 0.5
    w2 = jax.random.uniform(k2w, (1, C1, 2), jnp.float32, -bound2, bound2)
    b2 = jax.random.uniform(k2b, (1,), jnp.float32, -bound2, bound2)

    out = jax.block_until_ready(convnet_forward(x, w1, b1, w2, b2))
    assert out.shape == (B, 1, L), out.shape

    ref = ref_forward(x, w1, b1, w2, b2)
    if not jnp.allclose(out, ref, rtol=1e-4, atol=1e-4):
        raise AssertionError(
            f"mismatch vs reference, max abs err = {jnp.max(jnp.abs(out - ref))}")

    print("KERNEL_OK")
</pallas_src>

<mosaic_0001>
module attributes {stable_mosaic.version = 11 : i64} {
  func.func @_convnet_kernel(%arg0: i32, %arg1: memref<2x1x128xf32, #tpu.memory_space<vmem>>, %arg2: memref<2x60x1xf32, #tpu.memory_space<vmem>>, %arg3: memref<60x1xf32, #tpu.memory_space<vmem>>, %arg4: memref<2x60x1xf32, #tpu.memory_space<vmem>>, %arg5: memref<1x1xf32, #tpu.memory_space<vmem>>, %arg6: memref<2x1x128xf32, #tpu.memory_space<vmem>>) attributes {dimension_semantics = [#tpu.dimension_semantics<arbitrary>], iteration_bounds = array<i64: 1>, scalar_prefetch = 0 : i64, scratch_operands = 0 : i64, tpu.core_type = #tpu.core_type<tc>, window_params = [{pipeline_mode = #tpu.pipeline_mode<synchronous>, transform_indices = @transform_0, window_bounds = array<i64: 2, 1, 128>}, {pipeline_mode = #tpu.pipeline_mode<synchronous>, transform_indices = @transform_1, window_bounds = array<i64: 2, 60, 1>}, {pipeline_mode = #tpu.pipeline_mode<synchronous>, transform_indices = @transform_2, window_bounds = array<i64: 60, 1>}, {pipeline_mode = #tpu.pipeline_mode<synchronous>, transform_indices = @transform_3, window_bounds = array<i64: 2, 60, 1>}, {pipeline_mode = #tpu.pipeline_mode<synchronous>, transform_indices = @transform_4, window_bounds = array<i64: 1, 1>}, {pipeline_mode = #tpu.pipeline_mode<synchronous>, transform_indices = @transform_5, window_bounds = array<i64: 2, 1, 128>}]} {
    %c0 = arith.constant 0 : index
    %c0_0 = arith.constant 0 : index
    %c0_1 = arith.constant 0 : index
    %0 = vector.load %arg2[%c0, %c0_0, %c0_1] : memref<2x60x1xf32, #tpu.memory_space<vmem>>, vector<1x60x1xf32>
    %1 = vector.shape_cast %0 : vector<1x60x1xf32> to vector<60x1xf32>
    %c1 = arith.constant 1 : index
    %c0_2 = arith.constant 0 : index
    %c0_3 = arith.constant 0 : index
    %2 = vector.load %arg2[%c1, %c0_2, %c0_3] : memref<2x60x1xf32, #tpu.memory_space<vmem>>, vector<1x60x1xf32>
    %3 = vector.shape_cast %2 : vector<1x60x1xf32> to vector<60x1xf32>
    %c0_4 = arith.constant 0 : index
    %c0_5 = arith.constant 0 : index
    %4 = vector.load %arg3[%c0_4, %c0_5] : memref<60x1xf32, #tpu.memory_space<vmem>>, vector<60x1xf32>
    %c0_6 = arith.constant 0 : index
    %c0_7 = arith.constant 0 : index
    %c0_8 = arith.constant 0 : index
    %5 = vector.load %arg4[%c0_6, %c0_7, %c0_8] : memref<2x60x1xf32, #tpu.memory_space<vmem>>, vector<1x60x1xf32>
    %6 = vector.shape_cast %5 : vector<1x60x1xf32> to vector<60x1xf32>
    %c1_9 = arith.constant 1 : index
    %c0_10 = arith.constant 0 : index
    %c0_11 = arith.constant 0 : index
    %7 = vector.load %arg4[%c1_9, %c0_10, %c0_11] : memref<2x60x1xf32, #tpu.memory_space<vmem>>, vector<1x60x1xf32>
    %8 = vector.shape_cast %7 : vector<1x60x1xf32> to vector<60x1xf32>
    %c0_12 = arith.constant 0 : index
    %c0_13 = arith.constant 0 : index
    %9 = vector.load %arg5[%c0_12, %c0_13] : memref<1x1xf32, #tpu.memory_space<vmem>>, vector<1x1xf32>
    %cst = arith.constant 0.000000e+00 : f32
    %10 = vector.broadcast %cst : f32 to vector<1x1xf32>
    %c0_14 = arith.constant 0 : index
    %c0_15 = arith.constant 0 : index
    %c0_16 = arith.constant 0 : index
    %11 = vector.load %arg1[%c0_14, %c0_15, %c0_16] : memref<2x1x128xf32, #tpu.memory_space<vmem>>, vector<1x1x128xf32>
    %12 = vector.shape_cast %11 : vector<1x1x128xf32> to vector<1x128xf32>
    %13 = vector.extract_strided_slice %12 {offsets = [0, 0], sizes = [1, 127], strides = [1, 1]} : vector<1x128xf32> to vector<1x127xf32>
    %14 = tpu.concatenate %10, %13 in 1 : vector<1x1xf32>, vector<1x127xf32> -> vector<1x128xf32>
    %15 = vector.extract_strided_slice %12 {offsets = [0, 1], sizes = [1, 127], strides = [1, 1]} : vector<1x128xf32> to vector<1x127xf32>
    %16 = tpu.concatenate %15, %10 in 1 : vector<1x127xf32>, vector<1x1xf32> -> vector<1x128xf32>
    %17 = vector.broadcast %1 : vector<60x1xf32> to vector<60x128xf32>
    %18 = vector.broadcast %14 : vector<1x128xf32> to vector<60x128xf32>
    %19 = arith.mulf %17, %18 : vector<60x128xf32>
    %20 = vector.broadcast %3 : vector<60x1xf32> to vector<60x128xf32>
    %21 = vector.broadcast %12 : vector<1x128xf32> to vector<60x128xf32>
    %22 = arith.mulf %20, %21 : vector<60x128xf32>
    %23 = arith.addf %19, %22 : vector<60x128xf32>
    %24 = vector.broadcast %4 : vector<60x1xf32> to vector<60x128xf32>
    %25 = arith.addf %23, %24 : vector<60x128xf32>
    %cst_17 = arith.constant 0.000000e+00 : f32
    %26 = vector.broadcast %cst_17 : f32 to vector<60x128xf32>
    %27 = arith.maximumf %25, %26 : vector<60x128xf32>
    %28 = vector.broadcast %1 : vector<60x1xf32> to vector<60x128xf32>
    %29 = vector.broadcast %12 : vector<1x128xf32> to vector<60x128xf32>
    %30 = arith.mulf %28, %29 : vector<60x128xf32>
    %31 = vector.broadcast %3 : vector<60x1xf32> to vector<60x128xf32>
    %32 = vector.broadcast %16 : vector<1x128xf32> to vector<60x128xf32>
    %33 = arith.mulf %31, %32 : vector<60x128xf32>
    %34 = arith.addf %30, %33 : vector<60x128xf32>
    %35 = vector.broadcast %4 : vector<60x1xf32> to vector<60x128xf32>
    %36 = arith.addf %34, %35 : vector<60x128xf32>
    %cst_18 = arith.constant 0.000000e+00 : f32
    %37 = vector.broadcast %cst_18 : f32 to vector<60x128xf32>
    %38 = arith.maximumf %36, %37 : vector<60x128xf32>
    %39 = vector.broadcast %6 : vector<60x1xf32> to vector<60x128xf32>
    %40 = arith.mulf %39, %27 : vector<60x128xf32>
    %41 = vector.broadcast %8 : vector<60x1xf32> to vector<60x128xf32>
    %42 = arith.mulf %41, %38 : vector<60x128xf32>
    %43 = arith.addf %40, %42 : vector<60x128xf32>
    %cst_19 = arith.constant dense<0.000000e+00> : vector<128xf32>
    %44 = vector.multi_reduction <add>, %43, %cst_19 [0] : vector<60x128xf32> to vector<128xf32>
    %45 = vector.shape_cast %44 : vector<128xf32> to vector<1x128xf32>
    %46 = vector.broadcast %9 : vector<1x1xf32> to vector<1x128xf32>
    %47 = arith.addf %45, %46 : vector<1x128xf32>
    %cst_20 = arith.constant 0.000000e+00 : f32
    %48 = vector.broadcast %cst_20 : f32 to vector<1x128xf32>
    %49 = arith.maximumf %47, %48 : vector<1x128xf32>
    %c0_21 = arith.constant 0 : index
    %c0_22 = arith.constant 0 : index
    %c0_23 = arith.constant 0 : index
    %50 = vector.load %arg6[%c0_21, %c0_22, %c0_23] : memref<2x1x128xf32, #tpu.memory_space<vmem>>, vector<1x1x128xf32>
    %51 = vector.shape_cast %50 : vector<1x1x128xf32> to vector<1x128xf32>
    %52 = vector.shape_cast %49 : vector<1x128xf32> to vector<1x1x128xf32>
    tpu.vector_store %arg6[%c0_21, %c0_22, %c0_23], %52 {strides = array<i32>} : memref<2x1x128xf32, #tpu.memory_space<vmem>>, vector<1x1x128xf32>,
    %c1_24 = arith.constant 1 : index
    %c0_25 = arith.constant 0 : index
    %c0_26 = arith.constant 0 : index
    %53 = vector.load %arg1[%c1_24, %c0_25, %c0_26] : memref<2x1x128xf32, #tpu.memory_space<vmem>>, vector<1x1x128xf32>
    %54 = vector.shape_cast %53 : vector<1x1x128xf32> to vector<1x128xf32>
    %55 = vector.extract_strided_slice %54 {offsets = [0, 0], sizes = [1, 127], strides = [1, 1]} : vector<1x128xf32> to vector<1x127xf32>
    %56 = tpu.concatenate %10, %55 in 1 : vector<1x1xf32>, vector<1x127xf32> -> vector<1x128xf32>
    %57 = vector.extract_strided_slice %54 {offsets = [0, 1], sizes = [1, 127], strides = [1, 1]} : vector<1x128xf32> to vector<1x127xf32>
    %58 = tpu.concatenate %57, %10 in 1 : vector<1x127xf32>, vector<1x1xf32> -> vector<1x128xf32>
    %59 = vector.broadcast %1 : vector<60x1xf32> to vector<60x128xf32>
    %60 = vector.broadcast %56 : vector<1x128xf32> to vector<60x128xf32>
    %61 = arith.mulf %59, %60 : vector<60x128xf32>
    %62 = vector.broadcast %3 : vector<60x1xf32> to vector<60x128xf32>
    %63 = vector.broadcast %54 : vector<1x128xf32> to vector<60x128xf32>
    %64 = arith.mulf %62, %63 : vector<60x128xf32>
    %65 = arith.addf %61, %64 : vector<60x128xf32>
    %66 = vector.broadcast %4 : vector<60x1xf32> to vector<60x128xf32>
    %67 = arith.addf %65, %66 : vector<60x128xf32>
    %cst_27 = arith.constant 0.000000e+00 : f32
    %68 = vector.broadcast %cst_27 : f32 to vector<60x128xf32>
    %69 = arith.maximumf %67, %68 : vector<60x128xf32>
    %70 = vector.broadcast %1 : vector<60x1xf32> to vector<60x128xf32>
    %71 = vector.broadcast %54 : vector<1x128xf32> to vector<60x128xf32>
    %72 = arith.mulf %70, %71 : vector<60x128xf32>
    %73 = vector.broadcast %3 : vector<60x1xf32> to vector<60x128xf32>
    %74 = vector.broadcast %58 : vector<1x128xf32> to vector<60x128xf32>
    %75 = arith.mulf %73, %74 : vector<60x128xf32>
    %76 = arith.addf %72, %75 : vector<60x128xf32>
    %77 = vector.broadcast %4 : vector<60x1xf32> to vector<60x128xf32>
    %78 = arith.addf %76, %77 : vector<60x128xf32>
    %cst_28 = arith.constant 0.000000e+00 : f32
    %79 = vector.broadcast %cst_28 : f32 to vector<60x128xf32>
    %80 = arith.maximumf %78, %79 : vector<60x128xf32>
    %81 = vector.broadcast %6 : vector<60x1xf32> to vector<60x128xf32>
    %82 = arith.mulf %81, %69 : vector<60x128xf32>
    %83 = vector.broadcast %8 : vector<60x1xf32> to vector<60x128xf32>
    %84 = arith.mulf %83, %80 : vector<60x128xf32>
    %85 = arith.addf %82, %84 : vector<60x128xf32>
    %cst_29 = arith.constant dense<0.000000e+00> : vector<128xf32>
    %86 = vector.multi_reduction <add>, %85, %cst_29 [0] : vector<60x128xf32> to vector<128xf32>
    %87 = vector.shape_cast %86 : vector<128xf32> to vector<1x128xf32>
    %88 = vector.broadcast %9 : vector<1x1xf32> to vector<1x128xf32>
    %89 = arith.addf %87, %88 : vector<1x128xf32>
    %cst_30 = arith.constant 0.000000e+00 : f32
    %90 = vector.broadcast %cst_30 : f32 to vector<1x128xf32>
    %91 = arith.maximumf %89, %90 : vector<1x128xf32>
    %c1_31 = arith.constant 1 : index
    %c0_32 = arith.constant 0 : index
    %c0_33 = arith.constant 0 : index
    %92 = vector.load %arg6[%c1_31, %c0_32, %c0_33] : memref<2x1x128xf32, #tpu.memory_space<vmem>>, vector<1x1x128xf32>
    %93 = vector.shape_cast %92 : vector<1x1x128xf32> to vector<1x128xf32>
    %94 = vector.shape_cast %91 : vector<1x128xf32> to vector<1x1x128xf32>
    tpu.vector_store %arg6[%c1_31, %c0_32, %c0_33], %94 {strides = array<i32>} : memref<2x1x128xf32, #tpu.memory_space<vmem>>, vector<1x1x128xf32>,
    return
  }
  func.func @transform_0(%arg0: i32) -> (i32, i32, i32) {
    %c0_i32 = arith.constant 0 : i32
    %c0_i32_0 = arith.constant 0 : i32
    %c0_i32_1 = arith.constant 0 : i32
    %c0_i32_2 = arith.constant 0 : i32
    return %c0_i32, %c0_i32_0, %c0_i32_1 : i32, i32, i32
  }
  func.func @transform_1(%arg0: i32) -> (i32, i32, i32) {
    %c0_i32 = arith.constant 0 : i32
    %c0_i32_0 = arith.constant 0 : i32
    %c0_i32_1 = arith.constant 0 : i32
    %c0_i32_2 = arith.constant 0 : i32
    return %c0_i32, %c0_i32_0, %c0_i32_1 : i32, i32, i32
  }
  func.func @transform_2(%arg0: i32) -> (i32, i32) {
    %c0_i32 = arith.constant 0 : i32
    %c0_i32_0 = arith.constant 0 : i32
    %c0_i32_1 = arith.constant 0 : i32
    return %c0_i32, %c0_i32_0 : i32, i32
  }
  func.func @transform_3(%arg0: i32) -> (i32, i32, i32) {
    %c0_i32 = arith.constant 0 : i32
    %c0_i32_0 = arith.constant 0 : i32
    %c0_i32_1 = arith.constant 0 : i32
    %c0_i32_2 = arith.constant 0 : i32
    return %c0_i32, %c0_i32_0, %c0_i32_1 : i32, i32, i32
  }
  func.func @transform_4(%arg0: i32) -> (i32, i32) {
    %c0_i32 = arith.constant 0 : i32
    %c0_i32_0 = arith.constant 0 : i32
    %c0_i32_1 = arith.constant 0 : i32
    return %c0_i32, %c0_i32_0 : i32, i32
  }
  func.func @transform_5(%arg0: i32) -> (i32, i32, i32) {
    %c0_i32 = arith.constant 0 : i32
    %c0_i32_0 = arith.constant 0 : i32
    %c0_i32_1 = arith.constant 0 : i32
    %c0_i32_2 = arith.constant 0 : i32
    return %c0_i32, %c0_i32_0, %c0_i32_1 : i32, i32, i32
  }
}

</mosaic_0001>

<bundles_post_ra>
// kernel: tpu_custom_call.1
= control target key start
LH: loop header
LB: loop body
LE: loop exit
PB: predicated region body
PF: predicated region fallthrough
CT: control target
= control target key end

     0   :  { %s1088_s0 = inlined_call_operand.vmem [shape: f32[2,1,128], index: 0, kind: input, shape index: {}]   ;;  %s1089_s1 = inlined_call_operand.vmem [shape: f32[2,60,1], index: 1, kind: input, shape index: {}]   ;;  %s1090_s2 = inlined_call_operand.vmem [shape: f32[60,1], index: 2, kind: input, shape index: {}]   ;;  %s1091_s3 = inlined_call_operand.vmem [shape: f32[2,60,1], index: 3, kind: input, shape index: {}]   ;;  %s1092_s4 = inlined_call_operand.<no memory space> [shape: f32[1,1], index: 4, kind: input, shape index: {}]   ;;  %s1093_s5 = inlined_call_operand.hbm [shape: f32[2,1,128], index: 5, kind: output, shape index: {}]  }
   0x1   :  { %v10_v0 = vstv %s1092_s4 }
   0x2   :  { %11 = vst [vmem:[#allocation2] sm:$0x1] %v10_v0 }
   0x3   :  { %v675_v1 = vld [vmem:[%s1088_s0] ss:$0 sm:$0xff]  ;;  %v634_v3 = vmov 0   ;;  %s635_s24 = smov 1   ;;  %v24_v4 = vld [vmem:[%s1089_s1 + $0x8] sm:$0xff]  ;;  %s636_s26 = smov 127  }
   0x4   :  { %v23_v2 = vld [vmem:[%s1089_s1] sm:$0xff]  ;;  %608 = vset.pattern.permute.xlu1 %v634_v3  ;;  %72 = vrot.lane.b32.xlu0 %v675_v1, %s635_s24  ;;  %v25_v5 = vld [vmem:[%s1089_s1 + $0x10] sm:$0xff]  ;;  %v26_v6 = vld [vmem:[%s1089_s1 + $0x18] sm:$0xff] }
   0x5   :  { %84 = vperm.xlu1 %608, %v23_v2   ;;  %609 = vset.pattern.permute.xlu0 %v634_v3  ;;  %v28_v7 = vld [vmem:[%s1089_s1 + $0x28] sm:$0xff]  ;;  %v27_v8 = vld [vmem:[%s1089_s1 + $0x20] sm:$0xff]  ;;  %v30_v9 = vld [vmem:[%s1089_s1 + $0x38] sm:$0xf] }
   0x8   :  { %77 = vrot.lane.b32.xlu0 %v675_v1, %s636_s26 }
   0x9   :  { %89 = vperm.xlu1 %608, %v24_v4  }
   0xc   :  { %94 = vperm.xlu0 %609, %v25_v5  }
   0xd   :  { %99 = vperm.xlu1 %608, %v26_v6  }
  0x10   :  { %109 = vperm.xlu0 %609, %v28_v7  }
  0x11   :  { %104 = vperm.xlu1 %608, %v27_v8  }
  0x12   :  { %12 = vsyncpa [#allocation4], 0  ;;  %v29_v10 = vld [vmem:[%s1089_s1 + $0x30] sm:$0xff]  ;;  %v585_v11 = vld [vmem:[%s1089_s1 + $0x48] sm:$0xff]  ;;  %v122_v54 = vlaneseq  ;;  %vm75_vm0 = vcmask 7168   ;;  %vm80_vm1 = vcmask 1039360  }
  0x13   :  { %v584_v12 = vld [vmem:[%s1089_s1 + $0x40] sm:$0xff]  ;;  %v587_v13 = vld [vmem:[%s1089_s1 + $0x58] sm:$0xff]  ;;  %v586_v14 = vld [vmem:[%s1089_s1 + $0x50] sm:$0xff]  ;;  %vm401_vm2 = vcmask 1043456  }
  0x14   :  { %119 = vperm.xlu0 %609, %v30_v9   ;;  %v589_v15 = vld [vmem:[%s1089_s1 + $0x68] sm:$0xff]  ;;  %v588_v16 = vld [vmem:[%s1089_s1 + $0x60] sm:$0xff]  ;;  %v591_v17 = vld [vmem:[%s1089_s1 + $0x78] sm:$0xf]  ;;  %v123_v57 = vshrl.u32 %v122_v54, 7 }
  0x15   :  { %114 = vperm.xlu1 %608, %v29_v10   ;;  %v590_v18 = vld [vmem:[%s1089_s1 + $0x70] sm:$0xff]  ;;  %v41_v19 = vld [vmem:[%s1090_s2 + $0x8] sm:$0xff]  ;;  %v40_v20 = vld [vmem:[%s1090_s2] sm:$0xff] }
  0x16   :  { %v738_v21 = vld [vmem:[%s1088_s0 + $0x1] ss:$0 sm:$0xff]  ;;  %v43_v22 = vld [vmem:[%s1090_s2 + $0x18] sm:$0xff]  ;;  %v42_v23 = vld [vmem:[%s1090_s2 + $0x10] sm:$0xff]  ;;  %v832_v60 = vsub.s32 0, %v123_v57 }
  0x17   :  { %v49_v24 = vld [vmem:[%s1091_s3 + $0x8] sm:$0xff]  ;;  %v48_v25 = vld [vmem:[%s1091_s3] sm:$0xff]  ;;  %v50_v28 = vld [vmem:[%s1091_s3 + $0x10] sm:$0xff] }
  0x18   :  { %141 = vperm.xlu0 %609, %v585_v11   ;;  %v593_v26 = vld [vmem:[%s1091_s3 + $0x48] sm:$0xff]  ;;  %v592_v27 = vld [vmem:[%s1091_s3 + $0x40] sm:$0xff]  ;;  %v594_v31 = vld [vmem:[%s1091_s3 + $0x50] sm:$0xff]  ;;  %1099 = vst [vmem:[#allocation8_spill] sm:$0xff] %v832_v60 }
  0x19   :  { %136 = vperm.xlu1 %608, %v584_v12   ;;  %v44_v29 = vld [vmem:[%s1090_s2 + $0x20] sm:$0xff]  ;;  %v45_v30 = vld [vmem:[%s1090_s2 + $0x28] sm:$0xff]  ;;  %v595_v32 = vld [vmem:[%s1091_s3 + $0x58] sm:$0xff] }
  0x1a   :  { %v51_v33 = vld [vmem:[%s1091_s3 + $0x18] sm:$0xff]  ;;  %v52_v34 = vld [vmem:[%s1091_s3 + $0x20] sm:$0xff]  ;;  %v46_v35 = vld [vmem:[%s1090_s2 + $0x30] sm:$0xff] }
  0x1b   :  { %v47_v36 = vld [vmem:[%s1090_s2 + $0x38] sm:$0xf]  ;;  %v596_v37 = vld [vmem:[%s1091_s3 + $0x60] sm:$0xff]  ;;  %v597_v38 = vld [vmem:[%s1091_s3 + $0x68] sm:$0xff] }
  0x1c   :  { %151 = vperm.xlu0 %609, %v587_v13   ;;  %v53_v39 = vld [vmem:[%s1091_s3 + $0x28] sm:$0xff]  ;;  %v598_v40 = vld [vmem:[%s1091_s3 + $0x70] sm:$0xff]  ;;  %v599_v42 = vld [vmem:[%s1091_s3 + $0x78] sm:$0xf] }
  0x1d   :  { %146 = vperm.xlu1 %608, %v586_v14   ;;  %v54_v41 = vld [vmem:[%s1091_s3 + $0x30] sm:$0xff]  ;;  %v55_v43 = vld [vmem:[%s1091_s3 + $0x38] sm:$0xf]  ;;  %v65_v44 = vld [vmem:[#allocation2] sm:$0x1]  ;;  %s637_s3 = smov [#allocation3]  }
  0x1e   :  { %s573_s4 = sshll.u32 %s637_s3, 4  ;;  %s574_s4 = int_to_ptr.vmem [resolvable:$true] %s573_s4 }
  0x1f   :  { %s610_s27 = scalar_lea.vmem %s574_s4, 32  ;;  %p615_p1 = scmp.lt.s32.totalorder %s574_s4, %s574_s4 }
  0x20   :  { %161 = vperm.xlu0 %609, %v589_v15   ;;  %p611_p0 = scmp.ne.s32.totalorder %s574_s4, %s610_s27  ;;  %p616_p2 = scmp.lt.s32.totalorder %s610_s27, %s610_s27 }
  0x21   :  { %156 = vperm.xlu1 %608, %v588_v16  }
  0x22   :  { %p617_p3 = por %p616_p2, %p615_p1 }
  0x24   :  { %171 = vperm.xlu0 %609, %v591_v17   ;;  %p618_p4 = pnand %p617_p3, %p611_p0 }
  0x25   :  { %166 = vperm.xlu1 %608, %v590_v18  }
  0x28   :  { %198 = vperm.xlu0 %609, %v41_v19  }
  0x29   :  { %193 = vperm.xlu1 %608, %v40_v20  }
  0x2c   :  { %433 = vrot.lane.b32.xlu0 %v738_v21, %s636_s26 }
  0x2d   :  { %429 = vrot.lane.b32.xlu1 %v738_v21, %s635_s24 }
  0x30   :  { %208 = vperm.xlu0 %609, %v43_v22  }
  0x31   :  { %203 = vperm.xlu1 %608, %v42_v23  }
  0x34   :  { %298 = vperm.xlu0 %609, %v49_v24  }
  0x35   :  { %293 = vperm.xlu1 %608, %v48_v25  }
  0x38   :  { %346 = vperm.xlu0 %609, %v593_v26  }
  0x39   :  { %341 = vperm.xlu1 %608, %v592_v27  }
  0x3c   :  { %303 = vperm.xlu0 %609, %v50_v28  }
  0x3d   :  { %213 = vperm.xlu1 %608, %v44_v29  }
  0x40   :  { %218 = vperm.xlu0 %609, %v45_v30  }
  0x41   :  { %351 = vperm.xlu1 %608, %v594_v31  }
  0x44   :  { %356 = vperm.xlu0 %609, %v595_v32  }
  0x45   :  { %308 = vperm.xlu1 %608, %v51_v33  }
  0x48   :  { %313 = vperm.xlu0 %609, %v52_v34  }
  0x49   :  { %223 = vperm.xlu1 %608, %v46_v35  }
  0x4c   :  { %228 = vperm.xlu0 %609, %v47_v36  }
  0x4d   :  { %361 = vperm.xlu1 %608, %v596_v37  }
  0x50   :  { %366 = vperm.xlu0 %609, %v597_v38  }
  0x51   :  { %318 = vperm.xlu1 %608, %v53_v39  }
  0x54   :  { %371 = vperm.xlu0 %609, %v598_v40  }
  0x55   :  { %323 = vperm.xlu1 %608, %v54_v41  }
  0x58   :  { %376 = vperm.xlu0 %609, %v599_v42  }
  0x59   :  { %328 = vperm.xlu1 %608, %v55_v43  }
  0x5d   :  { %412 = vperm.xlu1 %608, %v65_v44  }
  0x76   :  { %v73_v45 = vpop.permute.xlu0 %72 }
  0x77   :  { %v76_v62 = vsel %vm75_vm0, 0.0, %v73_v45 }
  0x78   :  { %v125_v2 = vrot.slane %v76_v62, %v832_v60 }
  0x7a   :  { %v78_v47 = vpop.permute.xlu0 %77 }
  0x7b   :  { %v81_v63 = vsel %vm80_vm1, %v78_v47, 0.0 }
  0x7c   :  { %v844_v4 = vrot.slane %v81_v63, %v832_v60 }
  0x84   :  { %v810_v46 = vpop.permute.xlu1 %84 }
  0x85   :  { %v126_v5 = vmul.f32 %v125_v2, %v810_v46  ;;  %v247_v6 = vmul.f32 %v675_v1, %v810_v46  ;;  %v851_v7 = vmul.f32 %v738_v21, %v810_v46 }
  0x88   :  { %v812_v48 = vpop.permute.xlu1 %89 }
  0x89   :  { %v127_v8 = vmul.f32 %v125_v2, %v812_v48  ;;  %v248_v9 = vmul.f32 %v675_v1, %v812_v48  ;;  %v483_v10 = vmul.f32 %v738_v21, %v812_v48 }
  0x8b   :  { %v814_v49 = vpop.permute.xlu0 %94 }
  0x8c   :  { %v816_v50 = vpop.permute.xlu1 %99  ;;  %v128_v12 = vmul.f32 %v125_v2, %v814_v49  ;;  %v249_v13 = vmul.f32 %v675_v1, %v814_v49  ;;  %v865_v14 = vmul.f32 %v738_v21, %v814_v49 }
  0x8d   :  { %v129_v15 = vmul.f32 %v125_v2, %v816_v50  ;;  %v250_v17 = vmul.f32 %v675_v1, %v816_v50  ;;  %v874_v18 = vmul.f32 %v738_v21, %v816_v50 }
  0x8f   :  { %v818_v51 = vpop.permute.xlu0 %109 }
  0x90   :  { %v820_v52 = vpop.permute.xlu1 %104  ;;  %v131_v19 = vmul.f32 %v125_v2, %v818_v51  ;;  %v252_v20 = vmul.f32 %v675_v1, %v818_v51  ;;  %v881_v22 = vmul.f32 %v738_v21, %v818_v51 }
  0x91   :  { %v130_v23 = vmul.f32 %v125_v2, %v820_v52  ;;  %v251_v26 = vmul.f32 %v675_v1, %v820_v52  ;;  %v892_v27 = vmul.f32 %v738_v21, %v820_v52 }
  0x92   :  { %1100 = vst [vmem:[#allocation9_spill] sm:$0xff] %v881_v22 }
  0x93   :  { %v822_v53 = vpop.permute.xlu0 %119 }
  0x94   :  { %1097 = vst [vmem:[#allocation6_spill] sm:$0xff] %v822_v53  ;;  %v824_v55 = vpop.permute.xlu1 %114  ;;  %v901_v31 = vmul.f32 %v125_v2, %v822_v53  ;;  %v905_v32 = vmul.f32 %v675_v1, %v822_v53  ;;  %v909_v33 = vmul.f32 %v738_v21, %v822_v53 }
  0x95   :  { %1098 = vst [vmem:[#allocation7_spill] sm:$0xff] %v824_v55  ;;  %v912_v34 = vmul.f32 %v125_v2, %v824_v55  ;;  %v918_v36 = vmul.f32 %v675_v1, %v824_v55  ;;  %v922_v37 = vmul.f32 %v738_v21, %v824_v55 }
  0x96   :  { %1101 = vst [vmem:[#allocation10_spill] sm:$0xff] %v909_v33 }
  0x97   :  { %v826_v56 = vpop.permute.xlu0 %141  ;;  %1102 = vst [vmem:[#allocation11_spill] sm:$0xff] %v922_v37 }
  0x98   :  { %v828_v58 = vpop.permute.xlu1 %136  ;;  %v176_v24 = vmul.f32 %v675_v1, %v826_v56  ;;  %v260_v25 = vmul.f32 %v844_v4, %v826_v56  ;;  %v451_v38 = vmul.f32 %v738_v21, %v826_v56 }
  0x99   :  { %v175_v28 = vmul.f32 %v675_v1, %v828_v58  ;;  %v259_v29 = vmul.f32 %v844_v4, %v828_v58  ;;  %v450_v39 = vmul.f32 %v738_v21, %v828_v58 }
  0x9a   :  { %v184_v42 = vadd.f32 %v176_v24, %v127_v8  ;;  %v268_v43 = vadd.f32 %v260_v25, %v248_v9 }
  0x9b   :  { %v830_v59 = vpop.permute.xlu0 %151  ;;  %v183_v54 = vadd.f32 %v175_v28, %v126_v5  ;;  %v267_v57 = vadd.f32 %v259_v29, %v247_v6 }
  0x9c   :  { %v834_v61 = vpop.permute.xlu1 %146  ;;  %v178_v40 = vmul.f32 %v675_v1, %v830_v59  ;;  %v262_v41 = vmul.f32 %v844_v4, %v830_v59  ;;  %v938_v62 = vmul.f32 %v738_v21, %v830_v59 }
  0x9d   :  { %v177_v44 = vmul.f32 %v675_v1, %v834_v61  ;;  %v261_v45 = vmul.f32 %v844_v4, %v834_v61  ;;  %v452_v63 = vmul.f32 %v738_v21, %v834_v61 }
  0x9e   :  { %v270_v33 = vadd.f32 %v262_v41, %v250_v17 }
  0x9f   :  { %v838_v0 = vpop.permute.xlu0 %161  ;;  %v185_v55 = vadd.f32 %v177_v44, %v128_v12  ;;  %v269_v22 = vadd.f32 %v261_v45, %v249_v13 }
  0xa0   :  { %v841_v3 = vpop.permute.xlu1 %156  ;;  %v180_v2 = vmul.f32 %v675_v1, %v838_v0  ;;  %v264_v24 = vmul.f32 %v844_v4, %v838_v0 }
  0xa1   :  { %v179_v5 = vmul.f32 %v675_v1, %v841_v3  ;;  %v263_v28 = vmul.f32 %v844_v4, %v841_v3 }
  0xa2   :  { %v982_v12 = vadd.f32 %v180_v2, %v131_v19 }
  0xa3   :  { %v858_v11 = vpop.permute.xlu0 %171  ;;  %v978_v41 = vadd.f32 %v179_v5, %v130_v23 }
  0xa4   :  { %v868_v16 = vpop.permute.xlu1 %166  ;;  %v266_v13 = vmul.f32 %v844_v4, %v858_v11 }
  0xa5   :  { %v181_v23 = vmul.f32 %v675_v1, %v868_v16 }
  0xa7   :  { %v898_v30 = vpop.permute.xlu0 %198 }
  0xa8   :  { %v914_v35 = vpop.permute.xlu1 %193 }
  0xa9   :  { %v275_v5 = vadd.f32 %v267_v57, %v914_v35 }
  0xab   :  { %v434_v47 = vpop.permute.xlu0 %433 }
  0xac   :  { %v436_v8 = vsel %vm80_vm1, %v434_v47, 0.0  ;;  %v430_v9 = vpop.permute.xlu1 %429  ;;  %v958_v47 = vadd.f32 %v178_v40, %v129_v15 }
  0xad   :  { %v950_v6 = vrot.slane %v436_v8, %v832_v60  ;;  %v432_v25 = vsel %vm75_vm0, 0.0, %v430_v9  ;;  %v968_v9 = vmul.f32 %v738_v21, %v838_v0 }
  0xae   :  { %v956_v29 = vrot.slane %v432_v25, %v832_v60  ;;  %v972_v25 = vmul.f32 %v738_v21, %v841_v3  ;;  %v986_v60 = vadd.f32 %v263_v28, %v251_v26 }
  0xaf   :  { %v960_v53 = vpop.permute.xlu0 %208  ;;  %v495_v37 = vmul.f32 %v950_v6, %v826_v56  ;;  %v494_v8 = vmul.f32 %v950_v6, %v828_v58  ;;  %v980_v58 = vadd.f32 %v264_v24, %v252_v20 }
  0xb0   :  { %v204_v15 = vpop.permute.xlu1 %203  ;;  %v442_v17 = vmul.f32 %v956_v29, %v812_v48  ;;  %v441_v56 = vmul.f32 %v956_v29, %v810_v46  ;;  %v182_v48 = vmul.f32 %v675_v1, %v858_v11  ;;  %v992_v46 = vmul.f32 %v738_v21, %v858_v11 }
  0xb1   :  { %v503_v40 = vadd.f32 %v495_v37, %v483_v10  ;;  %v265_v10 = vmul.f32 %v844_v4, %v868_v16  ;;  %v502_v19 = vadd.f32 %v494_v8, %v851_v7  ;;  %v232_v37 = vadd.f32 %v898_v30, %v184_v42 }
  0xb2   :  { %v459_v44 = vadd.f32 %v451_v38, %v442_v17  ;;  %v458_v45 = vadd.f32 %v450_v39, %v441_v56  ;;  %v443_v38 = vmul.f32 %v956_v29, %v814_v49  ;;  %v496_v39 = vmul.f32 %v950_v6, %v834_v61 }
  0xb3   :  { %v299_v20 = vpop.permute.xlu0 %298  ;;  %v276_v4 = vadd.f32 %v268_v43, %v898_v30  ;;  %v511_v7 = vadd.f32 %v503_v40, %v898_v30  ;;  %v1010_v1 = vmul.f32 %v738_v21, %v868_v16  ;;  %v231_v42 = vadd.f32 %v914_v35, %v183_v54 }
  0xb4   :  { %v294_v26 = vpop.permute.xlu1 %293  ;;  %v467_v2 = vadd.f32 %v459_v44, %v898_v30  ;;  %v466_v24 = vadd.f32 %v458_v45, %v914_v35  ;;  %v1015_v49 = vadd.f32 %v266_v13, %v905_v32  ;;  %v510_v28 = vadd.f32 %v502_v19, %v914_v35 }
  0xb5   :  { %v497_v8 = vmul.f32 %v950_v6, %v830_v59  ;;  %v1021_v43 = vadd.f32 %v265_v10, %v918_v36  ;;  %v1024_v30 = vadd.f32 %v182_v48, %v901_v31  ;;  %v240_v21 = vmax.f32 %v232_v37, 0.0 }
  0xb6   :  { %v460_v54 = vadd.f32 %v452_v63, %v443_v38  ;;  %v504_v57 = vadd.f32 %v496_v39, %v865_v14  ;;  %v1028_v32 = vadd.f32 %v181_v23, %v912_v34  ;;  %v475_v56 = vmax.f32 %v467_v2, 0.0 }
  0xb7   :  { %v347_v61 = vpop.permute.xlu0 %346  ;;  %v474_v40 = vmax.f32 %v466_v24, 0.0  ;;  %v284_v35 = vmax.f32 %v276_v4, 0.0  ;;  %v519_v13 = vmax.f32 %v511_v7, 0.0  ;;  %v239_v44 = vmax.f32 %v231_v42, 0.0 }
  0xb8   :  { %v342_v17 = vpop.permute.xlu1 %341  ;;  %v283_v59 = vmax.f32 %v275_v5, 0.0  ;;  %v1031_v36 = vadd.f32 %v270_v33, %v960_v53  ;;  %v444_v31 = vmul.f32 %v956_v29, %v816_v50  ;;  %v518_v45 = vmax.f32 %v510_v28, 0.0 }
  0xb9   :  { %v233_v63 = vadd.f32 %v204_v15, %v185_v55  ;;  %v277_v10 = vadd.f32 %v269_v22, %v204_v15  ;;  %v505_v14 = vadd.f32 %v497_v8, %v874_v18  ;;  %v380_v34 = vmul.f32 %v347_v61, %v284_v35 }
  0xba   :  { %v379_v19 = vmul.f32 %v342_v17, %v283_v59  ;;  %v468_v23 = vadd.f32 %v460_v54, %v204_v15  ;;  %v512_v38 = vadd.f32 %v504_v57, %v204_v15  ;;  %v527_v39 = vmul.f32 %v475_v56, %v299_v20 }
  0xbb   :  { %v304_v48 = vpop.permute.xlu0 %303  ;;  %v526_v2 = vmul.f32 %v474_v40, %v294_v26  ;;  %v535_v24 = vmul.f32 %v519_v13, %v347_v61  ;;  %v534_v4 = vmul.f32 %v518_v45, %v342_v17  ;;  %v332_v33 = vmul.f32 %v299_v20, %v240_v21 }
  0xbc   :  { %v214_v37 = vpop.permute.xlu1 %213  ;;  %v331_v7 = vmul.f32 %v294_v26, %v239_v44  ;;  %v461_v42 = vadd.f32 %v938_v62, %v444_v31  ;;  %v445_v50 = vmul.f32 %v956_v29, %v820_v52  ;;  %v241_v55 = vmax.f32 %v233_v63, 0.0 }
  0xbd   :  { %v285_v5 = vmax.f32 %v277_v10, 0.0  ;;  %v513_v18 = vadd.f32 %v505_v14, %v960_v53  ;;  %v234_v28 = vadd.f32 %v960_v53, %v958_v47  ;;  %v388_v15 = vadd.f32 %v380_v34, %v332_v33 }
  0xbe   :  { %v387_v8 = vadd.f32 %v379_v19, %v331_v7  ;;  %v476_v54 = vmax.f32 %v468_v23, 0.0  ;;  %v286_v20 = vmax.f32 %v1031_v36, 0.0  ;;  %v543_v26 = vadd.f32 %v535_v24, %v527_v39  ;;  %v1103_v19 = vld [vmem:[#allocation9_spill] sm:$0xff] }
  0xbf   :  { %v219_v22 = vpop.permute.xlu0 %218  ;;  %v542_v21 = vadd.f32 %v534_v4, %v526_v2  ;;  %v520_v62 = vmax.f32 %v512_v38, 0.0  ;;  %v498_v52 = vmul.f32 %v950_v6, %v841_v3  ;;  %v469_v17 = vadd.f32 %v461_v42, %v960_v53  ;;  %v1104_v2 = vld [vmem:[#allocation7_spill] sm:$0xff] }
  0xc0   :  { %v352_v61 = vpop.permute.xlu1 %351  ;;  %v235_v57 = vadd.f32 %v214_v37, %v978_v41  ;;  %v462_v56 = vadd.f32 %v972_v25, %v445_v50  ;;  %v499_v47 = vmul.f32 %v950_v6, %v838_v0  ;;  %v333_v40 = vmul.f32 %v304_v48, %v241_v55  ;;  %v1105_v55 = vld [vmem:[#allocation11_spill] sm:$0xff] }
  0xc1   :  { %v521_v13 = vmax.f32 %v513_v18, 0.0  ;;  %v242_v44 = vmax.f32 %v234_v28, 0.0  ;;  %v446_v59 = vmul.f32 %v956_v29, %v818_v51  ;;  %v395_v36 = vadd.f32 %v388_v15, %v387_v8 }
  0xc2   :  { %v528_v31 = vmul.f32 %v476_v54, %v304_v48  ;;  %v470_v3 = vadd.f32 %v462_v56, %v214_v37  ;;  %v279_v53 = vadd.f32 %v986_v60, %v214_v37  ;;  %v381_v63 = vmul.f32 %v352_v61, %v285_v5 }
  0xc3   :  { %v357_v35 = vpop.permute.xlu0 %356  ;;  %v536_v41 = vmul.f32 %v520_v62, %v352_v61  ;;  %v506_v25 = vadd.f32 %v498_v52, %v892_v27  ;;  %v500_v0 = vmul.f32 %v950_v6, %v868_v16  ;;  %v550_v10 = vadd.f32 %v543_v26, %v542_v21 }
  0xc4   :  { %v309_v45 = vpop.permute.xlu1 %308  ;;  %v477_v14 = vmax.f32 %v469_v17, 0.0  ;;  %v243_v34 = vmax.f32 %v235_v57, 0.0  ;;  %v507_v23 = vadd.f32 %v499_v47, %v1103_v19  ;;  %v280_v48 = vadd.f32 %v980_v58, %v219_v22 }
  0xc5   :  { %v514_v51 = vadd.f32 %v506_v25, %v214_v37  ;;  %v463_v39 = vadd.f32 %v968_v9, %v446_v59  ;;  %v447_v60 = vmul.f32 %v956_v29, %v1104_v2  ;;  %v478_v24 = vmax.f32 %v470_v3, 0.0  ;;  %v1107_v59 = vld [vmem:[#allocation10_spill] sm:$0xff] }
  0xc6   :  { %v287_v27 = vmax.f32 %v279_v53, 0.0  ;;  %v515_v33 = vadd.f32 %v507_v23, %v219_v22  ;;  %v236_v16 = vadd.f32 %v219_v22, %v982_v12  ;;  %v389_v7 = vadd.f32 %v381_v63, %v333_v40 }
  0xc7   :  { %v314_v38 = vpop.permute.xlu0 %313  ;;  %v544_v42 = vadd.f32 %v536_v41, %v528_v31  ;;  %v471_v50 = vadd.f32 %v463_v39, %v219_v22  ;;  %v508_v5 = vadd.f32 %v500_v0, %v1105_v55  ;;  %v382_v18 = vmul.f32 %v357_v35, %v286_v20  ;;  %v1106_v22 = vld [vmem:[#allocation6_spill] sm:$0xff] }
  0xc8   :  { %v224_v4 = vpop.permute.xlu1 %223  ;;  %v537_v37 = vmul.f32 %v521_v13, %v357_v35  ;;  %v334_v28 = vmul.f32 %v309_v45, %v242_v44  ;;  %v529_v58 = vmul.f32 %v477_v14, %v309_v45  ;;  %v522_v9 = vmax.f32 %v514_v51, 0.0 }
  0xc9   :  { %v288_v8 = vmax.f32 %v280_v48, 0.0  ;;  %v464_v54 = vadd.f32 %v1010_v1, %v447_v60  ;;  %v501_v61 = vmul.f32 %v950_v6, %v858_v11  ;;  %v244_v21 = vmax.f32 %v236_v16, 0.0 }
  0xca   :  { %v281_v12 = vadd.f32 %v1021_v43, %v224_v4  ;;  %v516_v62 = vadd.f32 %v508_v5, %v224_v4  ;;  %v448_v52 = vmul.f32 %v956_v29, %v1106_v22  ;;  %v396_v20 = vadd.f32 %v395_v36, %v389_v7 }
  0xcb   :  { %v229_v15 = vpop.permute.xlu0 %228  ;;  %v523_v17 = vmax.f32 %v515_v33, 0.0  ;;  %v237_v57 = vadd.f32 %v224_v4, %v1028_v32  ;;  %v472_v56 = vadd.f32 %v464_v54, %v224_v4  ;;  %v551_v47 = vadd.f32 %v550_v10, %v544_v42 }
  0xcc   :  { %v362_v26 = vpop.permute.xlu1 %361  ;;  %v390_v40 = vadd.f32 %v382_v18, %v334_v28  ;;  %v545_v35 = vadd.f32 %v537_v37, %v529_v58  ;;  %v479_v1 = vmax.f32 %v471_v50, 0.0  ;;  %v335_v13 = vmul.f32 %v314_v38, %v243_v34 }
  0xcd   :  { %v383_v44 = vmul.f32 %v362_v26, %v287_v27  ;;  %v538_v11 = vmul.f32 %v522_v9, %v362_v26  ;;  %v509_v31 = vadd.f32 %v501_v61, %v1107_v59  ;;  %v530_v43 = vmul.f32 %v478_v24, %v314_v38 }
  0xce   :  { %v289_v3 = vmax.f32 %v281_v12, 0.0  ;;  %v524_v53 = vmax.f32 %v516_v62, 0.0  ;;  %v465_v29 = vadd.f32 %v992_v46, %v448_v52  ;;  %v245_v36 = vmax.f32 %v237_v57, 0.0 }
  0xcf   :  { %v367_v6 = vpop.permute.xlu0 %366  ;;  %v480_v63 = vmax.f32 %v472_v56, 0.0  ;;  %v282_v32 = vadd.f32 %v1015_v49, %v229_v15  ;;  %v517_v41 = vadd.f32 %v509_v31, %v229_v15  ;;  %v391_v34 = vadd.f32 %v383_v44, %v335_v13 }
  0xd0   :  { %v319_v45 = vpop.permute.xlu1 %318  ;;  %v384_v25 = vmul.f32 %v367_v6, %v288_v8  ;;  %v539_v0 = vmul.f32 %v523_v17, %v367_v6  ;;  %v546_v19 = vadd.f32 %v538_v11, %v530_v43  ;;  %v238_v51 = vadd.f32 %v229_v15, %v1024_v30  ;;  %v1108_v43 = vld [vmem:[#allocation8_spill] sm:$0xff] }
  0xd1   :  { %v336_v10 = vmul.f32 %v319_v45, %v244_v21  ;;  %v531_v14 = vmul.f32 %v479_v1, %v319_v45  ;;  %v473_v38 = vadd.f32 %v465_v29, %v229_v15  ;;  %v397_v60 = vadd.f32 %v396_v20, %v390_v40 }
  0xd2   :  { %v552_v46 = vadd.f32 %v551_v47, %v545_v35  ;;  %v290_v33 = vmax.f32 %v282_v32, 0.0  ;;  %v525_v16 = vmax.f32 %v517_v41, 0.0  ;;  %v246_v55 = vmax.f32 %v238_v51, 0.0 }
  0xd3   :  { %v372_v23 = vpop.permute.xlu0 %371  ;;  %v392_v27 = vadd.f32 %v384_v25, %v336_v10  ;;  %v547_v49 = vadd.f32 %v539_v0, %v531_v14  ;;  %v398_v7 = vadd.f32 %v397_v60, %v391_v34  ;;  %v481_v5 = vmax.f32 %v473_v38, 0.0 }
  0xd4   :  { %v385_v48 = vmul.f32 %v372_v23, %v289_v3  ;;  %v540_v39 = vmul.f32 %v524_v53, %v372_v23  ;;  %v324_v2 = vpop.permute.xlu1 %323  ;;  %v553_v42 = vadd.f32 %v552_v46, %v546_v19 }
  0xd5   :  { %v337_v24 = vmul.f32 %v324_v2, %v245_v36  ;;  %v532_v4 = vmul.f32 %v480_v63, %v324_v2  ;;  %v399_v8 = vadd.f32 %v398_v7, %v392_v27 }
  0xd6   :  { %v554_v54 = vadd.f32 %v553_v42, %v547_v49 }
  0xd7   :  { %v377_v50 = vpop.permute.xlu0 %376  ;;  %v393_v18 = vadd.f32 %v385_v48, %v337_v24  ;;  %v548_v37 = vadd.f32 %v540_v39, %v532_v4 }
  0xd8   :  { %v386_v30 = vmul.f32 %v377_v50, %v290_v33  ;;  %v541_v28 = vmul.f32 %v525_v16, %v377_v50  ;;  %v329_v58 = vpop.permute.xlu1 %328 }
  0xd9   :  { %v338_v15 = vmul.f32 %v329_v58, %v246_v55  ;;  %v533_v9 = vmul.f32 %v481_v5, %v329_v58  ;;  %v400_v21 = vadd.f32 %v399_v8, %v393_v18  ;;  %v555_v12 = vadd.f32 %v554_v54, %v548_v37 }
  0xdb   :  { %v394_v61 = vadd.f32 %v386_v30, %v338_v15  ;;  %v549_v26 = vadd.f32 %v541_v28, %v533_v9 }
  0xdc   :  { %v413_v44 = vpop.permute.xlu1 %412 }
  0xdd   :  { %v402_v62 = vsel %vm401_vm2, %v394_v61, 0.0  ;;  %v556_v22 = vsel %vm401_vm2, %v549_v26, 0.0  ;;  %v418_v45 = vrot.slane %v413_v44, %v1108_v43 }
  0xde   :  { %v403_v52 = vadd.f32 %v402_v62, %v400_v21  ;;  %v557_v20 = vadd.f32 %v556_v22, %v555_v12 }
  0xe0   :  { %v404_v17 = vrot.slane %v403_v52, 4  ;;  %v558_v57 = vrot.slane %v557_v20, 4 }
  0xe2   :  { %v405_v56 = vadd.f32 %v404_v17, %v403_v52  ;;  %v559_v47 = vadd.f32 %v558_v57, %v557_v20 }
  0xe4   :  { %v406_v40 = vrot.slane %v405_v56, 2  ;;  %v560_v35 = vrot.slane %v559_v47, 2 }
  0xe6   :  { %v407_v1 = vadd.f32 %v406_v40, %v405_v56  ;;  %v561_v13 = vadd.f32 %v560_v35, %v559_v47 }
  0xe8   :  { %v408_v11 = vrot.slane %v407_v1, 1  ;;  %v562_v6 = vrot.slane %v561_v13, 1 }
  0xea   :  { %v409_v59 = vadd.f32 %v408_v11, %v407_v1  ;;  %v563_v31 = vadd.f32 %v562_v6, %v561_v13 }
  0xec   :  { %v419_v3 = vadd.f32 %v418_v45, %v409_v59  ;;  %v564_v53 = vadd.f32 %v563_v31, %v418_v45 }
  0xee   :  { %v420_v29 = vmax.f32 %v419_v3, 0.0  ;;  %v565_v36 = vmax.f32 %v564_v53, 0.0 }
  0xf0   :  { %421 = vst [vmem:[#allocation3] sm:$0x1] %v420_v29  ;;  %567 = vst [vmem:[#allocation3 + $0x1] sm:$0x1] %v565_v36 }
  0xf1   :  { %621 = shalt.err (!%p618_p4)
}
  0xf2   :  { %s622_s30 = scalar_lea.hbm %s1093_s5, 32 }
  0xf3   :  { %p623_p5 = scmp.ne.s32.totalorder %s1093_s5, %s622_s30  ;;  %p626_p6 = scmp.lt.u32.totalorder %s622_s30, %s1093_s5 }
  0xf5   :  { %p628_p7 = pnand %p626_p6, %p623_p5 }
  0xf7   :  { %631 = shalt.err (!%p628_p7)
}
  0xf8   :  { %s638_s10 = smov 16  }
  0xf9   :  { %579 = dma.vmem_to_hbm [thread:$0]  %s574_s4, 32, %s1093_s5, [#allocation4], %s638_s10, %s638_s10, %s635_s24  }
  0xfa   :  { %632 = dma.done.wait [#allocation4], 32  }
  0xfb   :  { %633 = vsyncadd [#allocation4], 4294967264 }
  0xfc   :  { %583 = vsyncpa [#allocation4], 1 }

</bundles_post_ra>
